<compile_context>
chip_gen: v6e
topology: v6e:2x2x1
jax: 0.10.0
libtpu: 0.0.40
codegen_flags: <defaults>
</compile_context>

<pallas_src>
import functools

import jax
import jax.numpy as jnp
from jax import lax
from jax.experimental import pallas as pl
from jax.experimental.pallas import tpu as pltpu

_LANES = 128
_ROW_TILE = 1024      # (1024, 128) f32 block = 512 KiB; 2 in x 2 buf = 2 MiB VMEM
_NUM_SPLITS = 2       # leading "parallel" grid axis (uses both TCs on v7x)


def _round_up(x, m):
    return ((x + m - 1) // m) * m


def _bce_kernel(p_ref, t_ref, o_ref, acc_ref, *, n_elem, blocks_per_split):
    c = pl.program_id(0)   # split index          ("parallel")
    i = pl.program_id(1)   # row-tile within split ("arbitrary", reduction)

    rows_tile, lanes = acc_ref.shape

    @pl.when(i == 0)
    def _():
        acc_ref[...] = jnp.zeros_like(acc_ref)

    # Cast per-block inside the kernel: bf16 inputs only move half the HBM bytes.
    p = p_ref[...].astype(jnp.float32)
    t = t_ref[...].astype(jnp.float32)

    # Global flat element index of every slot in this (possibly partial or
    # clamped-duplicate) block; anything >= n_elem is padding / garbage.
    # TODO(synk): int32 index math overflows beyond ~2^31 elements.
    blk = c * blocks_per_split + i                          # nominal block id
    row = lax.broadcasted_iota(jnp.int32, (rows_tile, lanes), 0)
    lane = lax.broadcasted_iota(jnp.int32, (rows_tile, lanes), 1)
    idx = (blk * rows_tile + row) * lanes + lane
    valid = idx < n_elem
    # (p=1, t=1) yields exactly 0 loss under the clamped-log formula below.
    p = jnp.where(valid, p, jnp.float32(1.0))
    t = jnp.where(valid, t, jnp.float32(1.0))

    # Match PyTorch: clamp log terms at -100 (avoids -inf at p==0 / p==1).
    log_p = jnp.maximum(jnp.log(p), jnp.float32(-100.0))
    log_1mp = jnp.maximum(jnp.log(1.0 - p), jnp.float32(-100.0))
    #   -(t*log_p + (1-t)*log_1mp)  ==  (t-1)*log_1mp - t*log_p
    acc_ref[...] += (t - 1.0) * log_1mp - t * log_p

    @pl.when(i == pl.num_programs(1) - 1)
    def _():
        # Single sublane-group reduction per split -> lane-dense (8, 128)
        # partial-sum block.  Final cross-lane reduction happens in XLA.
        o_ref[...] = acc_ref[...].reshape(-1, 8, lanes).sum(axis=0)


def binary_cross_entropy_pallas(pred, target):
    """Mean BCE over all elements of `pred` / `target` (same shape)."""
    assert pred.shape == target.shape
    n_elem = int(pred.size)

    # Flatten in native dtype (free reshape, no convert pass).
    p_flat = jnp.ravel(pred)
    t_flat = jnp.ravel(target)

    # Only a tiny (<128 element) lane pad when n_elem isn't a multiple of 128;
    # the padded slots are masked in-kernel, so the fill value is irrelevant.
    rem = n_elem % _LANES
    if rem:
        pad = _LANES - rem
        p_flat = jnp.pad(p_flat, (0, pad))
        t_flat = jnp.pad(t_flat, (0, pad))

    rows = p_flat.shape[0] // _LANES
    p2 = p_flat.reshape(rows, _LANES)
    t2 = t_flat.reshape(rows, _LANES)

    # Big tile for HBM-roofline efficiency; shrink for tiny inputs.
    row_tile = min(_ROW_TILE, _round_up(rows, 8))
    n_blocks = pl.cdiv(rows, row_tile)
    blocks_per_split = pl.cdiv(n_blocks, _NUM_SPLITS)

    def in_map(c, i):
        # Clamp so the DMA stays in bounds when n_blocks doesn't split evenly;
        # clamped (duplicate) blocks are fully masked out in-kernel.
        return (jnp.minimum(c * blocks_per_split + i, n_blocks - 1), 0)

    kernel = functools.partial(
        _bce_kernel, n_elem=n_elem, blocks_per_split=blocks_per_split)

    partials = pl.pallas_call(
        kernel,
        out_shape=jax.ShapeDtypeStruct((_NUM_SPLITS * 8, _LANES), jnp.float32),
        grid_spec=pltpu.PrefetchScalarGridSpec(
            num_scalar_prefetch=0,
            grid=(_NUM_SPLITS, blocks_per_split),
            in_specs=[
                pl.BlockSpec((row_tile, _LANES), in_map),
                pl.BlockSpec((row_tile, _LANES), in_map),
            ],
            out_specs=pl.BlockSpec((8, _LANES), lambda c, i: (c, 0)),
            scratch_shapes=[pltpu.VMEM((row_tile, _LANES), jnp.float32)],
        ),
        compiler_params=pltpu.CompilerParams(
            dimension_semantics=("parallel", "arbitrary"),
        ),
    )(p2, t2)

    return jnp.sum(partials) * jnp.float32(1.0 / n_elem)


class BCE:
    """JAX/Pallas port of models/losses.py::BCE."""

    def __init__(self, branch="probability", target="label"):
        self.branch = branch
        self.target = target

    def __call__(self, _output, _input):
        if self.branch not in _output or self.target not in _input:
            return jnp.asarray(0, dtype=jnp.int32)
        return binary_cross_entropy_pallas(
            _output[self.branch], _input[self.target]
        )


if __name__ == "__main__":
    key = jax.random.PRNGKey(0)
    k1, k2, k3, k4 = jax.random.split(key, 4)

    def ref_bce(p, t):
        log_p = jnp.maximum(jnp.log(p), -100.0)
        log_1mp = jnp.maximum(jnp.log(1.0 - p), -100.0)
        return jnp.mean(-(t * log_p + (1.0 - t) * log_1mp))

    loss_fn = BCE(branch="probability", target="label")

    # NCHW-shaped prediction probabilities and binary labels (lane-aligned).
    shape = (2, 4, 16, 16)
    pred = jax.nn.sigmoid(jax.random.normal(k1, shape, dtype=jnp.float32))
    label = (jax.random.uniform(k2, shape) > 0.5).astype(jnp.float32)
    loss = jax.block_until_ready(
        loss_fn({"probability": pred}, {"label": label}))
    ref = ref_bce(pred, label)
    assert jnp.allclose(loss, ref, rtol=1e-5, atol=1e-6), (loss, ref)

    # Ragged size (not a multiple of 128) exercises the in-kernel masking and
    # the clamped-duplicate-block path.
    shape2 = (2, 3, 7, 5)
    pred2 = jax.nn.sigmoid(jax.random.normal(k3, shape2, dtype=jnp.float32))
    label2 = (jax.random.uniform(k4, shape2) > 0.5).astype(jnp.float32)
    loss2 = jax.block_until_ready(
        loss_fn({"probability": pred2}, {"label": label2}))
    ref2 = ref_bce(pred2, label2)
    assert jnp.allclose(loss2, ref2, rtol=1e-5, atol=1e-6), (loss2, ref2)

    print("KERNEL_OK")
</pallas_src>

<mosaic_0001>
module attributes {stable_mosaic.version = 11 : i64} {
  func.func @_bce_kernel(%arg0: i32, %arg1: i32, %arg2: memref<16x128xf32, #tpu.memory_space<vmem>>, %arg3: memref<16x128xf32, #tpu.memory_space<vmem>>, %arg4: memref<8x128xf32, #tpu.memory_space<vmem>>, %arg5: memref<16x128xf32, #tpu.memory_space<vmem>>) attributes {dimension_semantics = [#tpu.dimension_semantics<parallel>, #tpu.dimension_semantics<arbitrary>], iteration_bounds = array<i64: 2, 1>, scalar_prefetch = 0 : i64, scratch_operands = 1 : i64, tpu.core_type = #tpu.core_type<tc>, window_params = [{transform_indices = @transform_0, window_bounds = array<i64: 16, 128>}, {transform_indices = @transform_1, window_bounds = array<i64: 16, 128>}, {transform_indices = @transform_2, window_bounds = array<i64: 8, 128>}]} {
    %c0_i32 = arith.constant 0 : i32
    %0 = arith.cmpi eq, %arg1, %c0_i32 : i32
    %1 = arith.extui %0 : i1 to i32
    %c0_i32_0 = arith.constant 0 : i32
    %2 = arith.cmpi ne, %1, %c0_i32_0 : i32
    scf.if %2 {
      %cst_15 = arith.constant 0.000000e+00 : f32
      %40 = vector.broadcast %cst_15 : f32 to vector<16x128xf32>
      %c0_16 = arith.constant 0 : index
      %c0_17 = arith.constant 0 : index
      %41 = vector.load %arg5[%c0_16, %c0_17] : memref<16x128xf32, #tpu.memory_space<vmem>>, vector<16x128xf32>
      tpu.vector_store %arg5[%c0_16, %c0_17], %40 {strides = array<i32>} : memref<16x128xf32, #tpu.memory_space<vmem>>, vector<16x128xf32>,
    } else {
    }
    %c0 = arith.constant 0 : index
    %c0_1 = arith.constant 0 : index
    %3 = vector.load %arg2[%c0, %c0_1] : memref<16x128xf32, #tpu.memory_space<vmem>>, vector<16x128xf32>
    %c0_2 = arith.constant 0 : index
    %c0_3 = arith.constant 0 : index
    %4 = vector.load %arg3[%c0_2, %c0_3] : memref<16x128xf32, #tpu.memory_space<vmem>>, vector<16x128xf32>
    %c1_i32 = arith.constant 1 : i32
    %5 = arith.muli %arg0, %c1_i32 : i32
    %6 = arith.addi %5, %arg1 : i32
    %7 = tpu.iota {dimensions = array<i32: 0>} : vector<16x128xi32>
    %8 = tpu.iota {dimensions = array<i32: 1>} : vector<16x128xi32>
    %c16_i32 = arith.constant 16 : i32
    %9 = arith.muli %6, %c16_i32 : i32
    %10 = vector.broadcast %9 : i32 to vector<16x128xi32>
    %11 = arith.addi %10, %7 : vector<16x128xi32>
    %c128_i32 = arith.constant 128 : i32
    %12 = vector.broadcast %c128_i32 : i32 to vector<16x128xi32>
    %13 = arith.muli %11, %12 : vector<16x128xi32>
    %14 = arith.addi %13, %8 : vector<16x128xi32>
    %c2048_i32 = arith.constant 2048 : i32
    %15 = vector.broadcast %c2048_i32 : i32 to vector<16x128xi32>
    %16 = arith.cmpi slt, %14, %15 : vector<16x128xi32>
    %cst = arith.constant 1.000000e+00 : f32
    %17 = vector.broadcast %cst : f32 to vector<16x128xf32>
    %18 = arith.select %16, %3, %17 : vector<16x128xi1>, vector<16x128xf32>
    %cst_4 = arith.constant 1.000000e+00 : f32
    %19 = vector.broadcast %cst_4 : f32 to vector<16x128xf32>
    %20 = arith.select %16, %4, %19 : vector<16x128xi1>, vector<16x128xf32>
    %21 = math.log %18 : vector<16x128xf32>
    %cst_5 = arith.constant -1.000000e+02 : f32
    %22 = vector.broadcast %cst_5 : f32 to vector<16x128xf32>
    %23 = arith.maximumf %21, %22 : vector<16x128xf32>
    %cst_6 = arith.constant 1.000000e+00 : f32
    %24 = vector.broadcast %cst_6 : f32 to vector<16x128xf32>
    %25 = arith.subf %24, %18 : vector<16x128xf32>
    %26 = math.log %25 : vector<16x128xf32>
    %cst_7 = arith.constant -1.000000e+02 : f32
    %27 = vector.broadcast %cst_7 : f32 to vector<16x128xf32>
    %28 = arith.maximumf %26, %27 : vector<16x128xf32>
    %c0_8 = arith.constant 0 : index
    %c0_9 = arith.constant 0 : index
    %29 = vector.load %arg5[%c0_8, %c0_9] : memref<16x128xf32, #tpu.memory_space<vmem>>, vector<16x128xf32>
    %cst_10 = arith.constant 1.000000e+00 : f32
    %30 = vector.broadcast %cst_10 : f32 to vector<16x128xf32>
    %31 = arith.subf %20, %30 : vector<16x128xf32>
    %32 = arith.mulf %31, %28 : vector<16x128xf32>
    %33 = arith.mulf %20, %23 : vector<16x128xf32>
    %34 = arith.subf %32, %33 : vector<16x128xf32>
    %35 = arith.addf %29, %34 : vector<16x128xf32>
    %c0_11 = arith.constant 0 : index
    %c0_12 = arith.constant 0 : index
    %36 = vector.load %arg5[%c0_11, %c0_12] : memref<16x128xf32, #tpu.memory_space<vmem>>, vector<16x128xf32>
    tpu.vector_store %arg5[%c0_11, %c0_12], %35 {strides = array<i32>} : memref<16x128xf32, #tpu.memory_space<vmem>>, vector<16x128xf32>,
    %c0_i32_13 = arith.constant 0 : i32
    %37 = arith.cmpi eq, %arg1, %c0_i32_13 : i32
    %38 = arith.extui %37 : i1 to i32
    %c0_i32_14 = arith.constant 0 : i32
    %39 = arith.cmpi ne, %38, %c0_i32_14 : i32
    scf.if %39 {
      %c0_15 = arith.constant 0 : index
      %c0_16 = arith.constant 0 : index
      %40 = vector.load %arg5[%c0_15, %c0_16] : memref<16x128xf32, #tpu.memory_space<vmem>>, vector<16x128xf32>
      %41 = vector.shape_cast %40 : vector<16x128xf32> to vector<2x8x128xf32>
      %cst_17 = arith.constant dense<0.000000e+00> : vector<8x128xf32>
      %42 = vector.multi_reduction <add>, %41, %cst_17 [0] : vector<2x8x128xf32> to vector<8x128xf32>
      %c0_18 = arith.constant 0 : index
      %c0_19 = arith.constant 0 : index
      %43 = vector.load %arg4[%c0_18, %c0_19] : memref<8x128xf32, #tpu.memory_space<vmem>>, vector<8x128xf32>
      tpu.vector_store %arg4[%c0_18, %c0_19], %42 {strides = array<i32>} : memref<8x128xf32, #tpu.memory_space<vmem>>, vector<8x128xf32>,
    } else {
    }
    return
  }
  func.func @transform_0(%arg0: i32, %arg1: i32) -> (i32, i32) {
    %c1_i32 = arith.constant 1 : i32
    %0 = arith.muli %arg0, %c1_i32 : i32
    %1 = arith.addi %0, %arg1 : i32
    %c0_i32 = arith.constant 0 : i32
    %2 = arith.minsi %1, %c0_i32 : i32
    %c0_i32_0 = arith.constant 0 : i32
    %c0_i32_1 = arith.constant 0 : i32
    return %2, %c0_i32_0 : i32, i32
  }
  func.func @transform_1(%arg0: i32, %arg1: i32) -> (i32, i32) {
    %c1_i32 = arith.constant 1 : i32
    %0 = arith.muli %arg0, %c1_i32 : i32
    %1 = arith.addi %0, %arg1 : i32
    %c0_i32 = arith.constant 0 : i32
    %2 = arith.minsi %1, %c0_i32 : i32
    %c0_i32_0 = arith.constant 0 : i32
    %c0_i32_1 = arith.constant 0 : i32
    return %2, %c0_i32_0 : i32, i32
  }
  func.func @transform_2(%arg0: i32, %arg1: i32) -> (i32, i32) {
    %c0_i32 = arith.constant 0 : i32
    %c0_i32_0 = arith.constant 0 : i32
    return %arg0, %c0_i32 : i32, i32
  }
}

</mosaic_0001>

<bundles_post_ra>
// kernel: tpu_custom_call.1
= control target key start
LH: loop header
LB: loop body
LE: loop exit
PB: predicated region body
PF: predicated region fallthrough
CT: control target
= control target key end

     0   :  { %7 = vsyncpa [#allocation4], 0  ;;  %s910_s0 = inlined_call_operand.hbm [shape: f32[16,128], index: 0, kind: input, shape index: {}]   ;;  %s911_s1 = inlined_call_operand.hbm [shape: f32[16,128], index: 1, kind: input, shape index: {}]   ;;  %s912_s2 = inlined_call_operand.hbm [shape: f32[16,128], index: 2, kind: output, shape index: {}]  }
   0x1   :  { %9 = vsyncpa [#allocation4 + $0x1], 0 }
   0x2   :  { %10 = vsyncpa [#allocation7], 0 }
   0x3   :  { %12 = vsyncpa [#allocation7 + $0x1], 0 }
   0x4   :  { %13 = vsyncpa [#allocation5], 0 }
   0x5   :  { %15 = vsyncpa [#allocation5 + $0x1], 0  ;;  %s727_s9 = smov 0   ;;  %s729_s10 = smov 0  }
   0x6   :  { %s731_s11 = smov 0   ;;  %s733_s12 = smov 0  }
   0x7   :  { %s735_s13 = smov 0   ;;  %s737_s14 = smov 0  }
   0x8   :  { %s739_s15 = smov 0   ;;  %s741_s16 = smov 0  }
   0x9 LB: > { %s420_s17 = sadd.s32 4294967295, %s705_s16   ;;  %s421_s18 = sadd.s32 4294967294, %s705_s16   ;;  %s705_s16 = sphi %s741_s16, %s21_s16   ;;  %s701_s15 = sphi %s739_s15, %s931_s15   ;;  %s697_s14 = sphi %s737_s14, %s930_s14   ;;  %s693_s13 = sphi %s735_s13, %s900_s13   ;;  %s689_s12 = sphi %s733_s12, %s929_s12   ;;  %s685_s11 = sphi %s731_s11, %s928_s11   ;;  %s681_s10 = sphi %s729_s10, %s927_s10   ;;  %s677_s9 = sphi %s727_s9, %s926_s9  }
   0xa   : > { %s33_s19 = sadd.s32 1, %s701_s15  ;;  %p674_p1 = scmp.ne.s32.totalorder %s693_s13, 0 }
   0xb   : > { %p35_p0 = scmp.ge.s32.totalorder %s33_s19, 2  ;;  %p54_p2 = scmp.eq.s32.totalorder %s705_s16, 0 }
   0xc   : > { %p59_p3 = scmp.ne.s32.totalorder %s693_s13, %s689_s12  ;;  %p60_p5 = scmp.eq.s32.totalorder %s420_s17, 0 }
   0xd   : > { %s933_s19 = smov (%p35_p0, %s33_s19), 0  ;;  %p773_p4 = por %p674_p1, %p54_p2 }
   0xe   : > { %p777_p6 = por %p60_p5, %p59_p3  ;;  %s101_s22 = ssub.s32 %s701_s15, %s933_s19 }
   0xf   : > { %p102_p7 = scmp.eq.s32.totalorder %s101_s22, 0  ;;  %s104_s23 = sadd.s32 1, %s685_s11 }
  0x10   : > { %s916_s21 = scalar_select %p777_p6, 1, 0 }
  0x11   : > { %s785_s24 = scalar_select %p102_p7, %s685_s11, %s104_s23  }
  0x12   : > { %p114_p8 = scmp.ne.s32.totalorder %s685_s11, %s681_s10  ;;  %p115_p9 = scmp.eq.s32.totalorder %s420_s17, 1 }
  0x13   : > { %p120_p10 = scmp.ne.s32.totalorder %s681_s10, %s677_s9  ;;  %p121_p11 = scmp.eq.s32.totalorder %s421_s18, 1 }
  0x14   : > { %p791_p12 = por %p115_p9, %p114_p8  ;;  %p460_p1 = scmp.lt.s32.totalorder %s705_s16, 2 }
  0x15   : > { %p796_p0 = por %p121_p11, %p120_p10  ;;  %s707_s27 = smov [#allocation3]  }
  0x16   : > { %s917_s25 = scalar_select %p791_p12, 1, 0 }
  0x17   : > { %s918_s26 = scalar_select %p796_p0, 1, 0 }
  0x18   : > { %s155_s28 = sshll.u32 %s707_s27, 4  ;;  %p803_p2 = pnand %p460_p1, %p773_p4  ;;  %s156_s28 = int_to_ptr.vmem [resolvable:$true] %s155_s28 }
  0x19   : > { %s544_s4 = scalar_lea.hbm %s910_s0, 256 }
  0x1a   : > { %p545_p3 = scmp.ne.s32.totalorder %s910_s0, %s544_s4  ;;  %p546_p5 = pneg %p803_p2 }
  0x1b   : > { %p551_p8 = scmp.lt.s32.totalorder %s544_s4, %s544_s4 }
  0x1c   : > { %p547_p7 = pnand %p546_p5, %p545_p3 }
  0x1e   : > { %p548_p4 = pneg %p547_p7 }
  0x20   : > { %p553_p9 = pnand %p551_p8, %p548_p4 }
  0x22   : > { %556 = shalt.err (!%p553_p9)
}
  0x23   : > { %s557_s7 = scalar_lea.vmem %s156_s28, 256  ;;  %s564_s8 = scalar_lea.vmem %s156_s28, 512 }
  0x24   : > { %p558_p10 = scmp.ne.s32.totalorder %s156_s28, %s557_s7  ;;  %p565_p13 = scmp.lt.s32.totalorder %s156_s28, %s156_s28 }
  0x25   : > { %p566_p0 = scmp.lt.s32.totalorder %s564_s8, %s557_s7 }
  0x26   : > { %p560_p11 = pnand %p558_p10, %p546_p5 }
  0x27   : > { %p567_p12 = por %p566_p0, %p565_p13 }
  0x28   : > { %p561_p1 = pneg %p560_p11 }
  0x2a   : > { %p568_p6 = pnand %p567_p12, %p561_p1 }
  0x2c   : > { %571 = shalt.err (!%p568_p6)
}
  0x2d   : > { %s708_s12 = smov 128   ;;  %s709_s17 = smov 8  }
  0x2e   : > { %452 = dma.hbm_to_vmem [thread:$0]  (!%p803_p2), %s910_s0, 256, %s156_s28, [#allocation4], %s708_s12, %s708_s12, %s709_s17  }
  0x2f   : > { %p430_p3 = scmp.ge.s32.totalorder %s705_s16, 1  ;;  %p187_p7 = scmp.lt.s32.totalorder %s705_s16, 3 }
  0x30   : > { %s710_s23 = smov [#allocation6]   ;;  %s572_s4 = scalar_lea.hbm %s911_s1, 256 }
  0x31   : > { %p828_p4 = pnand %p430_p3, %p187_p7  ;;  %s179_s27 = sshll.u32 %s710_s23, 4  ;;  %s180_s27 = int_to_ptr.vmem [resolvable:$true] %s179_s27 }
  0x32   : > { %p573_p6 = scmp.ne.s32.totalorder %s911_s1, %s572_s4  ;;  %p579_p0 = scmp.lt.s32.totalorder %s572_s4, %s572_s4 }
  0x33   : > { %s920_s22 = scalar_select %p828_p4, 1, 0 }
  0x34   : > { %p575_p12 = pnand %p573_p6, %p546_p5 }
  0x36   : > { %p576_p13 = pneg %p575_p12 }
  0x38   : > { %p581_p8 = pnand %p579_p0, %p576_p13 }
  0x3a   : > { %584 = shalt.err (!%p581_p8)
}
  0x3b   : > { %s585_s28 = scalar_lea.vmem %s180_s27, 256  ;;  %s592_s7 = scalar_lea.vmem %s180_s27, 512 }
  0x3c   : > { %p586_p9 = scmp.ne.s32.totalorder %s180_s27, %s585_s28  ;;  %p593_p1 = scmp.lt.s32.totalorder %s180_s27, %s180_s27 }
  0x3d   : > { %p594_p3 = scmp.lt.s32.totalorder %s592_s7, %s585_s28 }
  0x3e   : > { %p588_p10 = pnand %p586_p9, %p546_p5 }
  0x3f   : > { %p595_p7 = por %p594_p3, %p593_p1 }
  0x40   : > { %p589_p11 = pneg %p588_p10 }
  0x42   : > { %p596_p4 = pnand %p595_p7, %p589_p11 }
  0x44   : > { %599 = shalt.err (!%p596_p4)
}
  0x45   : > { %455 = dma.hbm_to_vmem [thread:$0]  (!%p803_p2), %s911_s1, 256, %s180_s27, [#allocation7], %s708_s12, %s708_s12, %s709_s17  }
  0x46   : > { %p921_p6 = scmp.ne.s32.totalorder %s920_s22, 0 }
  0x47   : > { %s193_s20 = sand.u32 (!%p921_p6), 1, %s693_s13   ;;  %p922_p5 = scmp.ne.s32.totalorder (!%p921_p6), %s916_s21, 0 }
  0x48   : > { %191 = sbr.rel (%p921_p6) target bundleno = 133 (0x85), region = 28  ;;  %s431_s23 = sshll.u32 (!%p921_p6), %s193_s20, 4 }
  0x49   : > { %s194_s30 = scalar_lea.sflag (!%p921_p6), [#allocation4], %s193_s20  ;;  %s197_s3 = scalar_lea.vmem (!%p921_p6), [#allocation3], %s431_s23 }
  0x4d   : > { %663 = dma.done.wait (%p922_p5), %s194_s30, 256  }
  0x4e   : > { %665 = vsyncadd (%p922_p5), %s194_s30, 4294967040  ;;  %s203_s29 = scalar_lea.sflag [#allocation7], %s193_s20  ;;  %s206_s4 = scalar_lea.vmem [#allocation6], %s431_s23 }
  0x4f   : > { %667 = dma.done.wait (%p922_p5), %s203_s29, 256  }
  0x50   : > { %669 = vsyncadd (%p922_p5), %s203_s29, 4294967040  ;;  %v251_v0 = vlaneseq  ;;  %s434_s12 = sshll.u32 %s697_s14, 4  ;;  %v246_v8 = vld [vmem:[%s197_s3] sm:$0xff]  ;;  %v247_v11 = vld [vmem:[%s197_s3 + $0x8] sm:$0xff]  ;;  %s229_s21 = sand.u32 1, %s681_s10  }
  0x51   : > { %v257_v1 = vstv %s434_s12  ;;  %v248_v17 = vld [vmem:[%s206_s4] sm:$0xff]  ;;  %v249_v18 = vld [vmem:[%s206_s4 + $0x8] sm:$0xff]  ;;  %s433_s17 = sshll.u32 %s229_s21, 3  ;;  %s438_s5 = sshll.u32 %s697_s14, 7 }
  0x52   : > { %v252_v2 = vshrl.u32 %v251_v0, 7  ;;  %v255_v4 = vand.u32 127, %v251_v0  ;;  %s231_s22 = scalar_lea.vmem [#allocation8], %s433_s17  ;;  %s317_s7 = scalar_lea.hbm %s912_s2, %s438_s5 }
  0x53   : > { %s319_s27 = sshll.u32 %s231_s22, 4  ;;  %s306_s8 = scalar_lea.sflag [#allocation5], %s229_s21  ;;  %s320_s27 = int_to_ptr.vmem [resolvable:$true] %s319_s27 }
  0x54   : > { %v253_v3 = vadd.s32 8, %v252_v2  ;;  %v258_v5 = vadd.s32 %v257_v1, %v252_v2  ;;  %s600_s18 = scalar_lea.vmem %s320_s27, 128  ;;  %p923_p4 = scmp.ne.s32.totalorder %s917_s25, 0 }
  0x55   : > { %p601_p2 = scmp.ne.s32.totalorder %s320_s27, %s600_s18  ;;  %s711_s20 = smov [#allocation8]  }
  0x56   : > { %v259_v6 = vadd.s32 %v257_v1, %v253_v3  ;;  %v260_v7 = vmul.u32 128, %v258_v5  ;;  %s604_s23 = sshll.u32 %s711_s20, 4  ;;  %s605_s23 = int_to_ptr.vmem [resolvable:$false] %s604_s23 }
  0x57   : > { %p602_p12 = pnand %p601_p2, %p923_p4  ;;  %s606_s30 = scalar_lea.vmem %s605_s23, 256 }
  0x58   : > { %v261_v9 = vmul.u32 128, %v259_v6  ;;  %v262_v10 = vadd.s32 %v260_v7, %v255_v4  ;;  %p607_p0 = scmp.lt.s32.totalorder %s320_s27, %s605_s23  ;;  %p608_p8 = scmp.lt.s32.totalorder %s606_s30, %s600_s18 }
  0x59   : > { %p603_p13 = pneg %p602_p12 }
  0x5a   : > { %v263_v12 = vadd.s32 %v261_v9, %v255_v4  ;;  %vm264_vm0 = vcmp.lt.s32.totalorder %v262_v10, 2048  ;;  %p609_p9 = por %p608_p8, %p607_p0 }
  0x5b   : > { %v266_v13 = vsel %vm264_vm0, %v246_v8, 1.0  ;;  %v268_v20 = vsel %vm264_vm0, %v248_v17, 1.0 }
  0x5c   : > { %vm265_vm1 = vcmp.lt.s32.totalorder %v263_v12, 2048  ;;  %536 = vlog2.f32 %v266_v13  ;;  %v276_v14 = vsub.f32 1.0, %v266_v13  ;;  %v435_v29 = vadd.f32 -1.0, %v268_v20  ;;  %p610_p10 = pnand %p609_p9, %p603_p13 }
  0x5d   : > { %v267_v15 = vsel %vm265_vm1, %v247_v11, 1.0  ;;  %v269_v23 = vsel %vm265_vm1, %v249_v18, 1.0 }
  0x5e   : > { %538 = vlog2.f32 %v267_v15  ;;  %v277_v16 = vsub.f32 1.0, %v267_v15  ;;  %v436_v32 = vadd.f32 -1.0, %v269_v23 }
  0x5f   : > { %540 = vlog2.f32 %v276_v14 }
  0x60   : > { %542 = vlog2.f32 %v277_v16 }
  0x69   : > { %v537_v19 = vpop.eup %536 }
  0x6a   : > { %v271_v21 = vmul.f32 0.6931472, %v537_v19 }
  0x6b   : > { %v539_v22 = vpop.eup %538 }
  0x6c   : > { %v541_v24 = vpop.eup %540  ;;  %v273_v25 = vmul.f32 0.6931472, %v539_v22  ;;  %v274_v26 = vmax.f32 %v271_v21, -100.0 }
  0x6d   : > { %v543_v27 = vpop.eup %542  ;;  %v279_v28 = vmul.f32 0.6931472, %v541_v24 }
  0x6e   : > { %v275_v30 = vmax.f32 %v273_v25, -100.0  ;;  %v281_v31 = vmul.f32 0.6931472, %v543_v27  ;;  %v290_v34 = vmul.f32 %v274_v26, %v268_v20 }
  0x6f   : > { %v282_v33 = vmax.f32 %v279_v28, -100.0 }
  0x70   : > { %v283_v35 = vmax.f32 %v281_v31, -100.0  ;;  %v291_v36 = vmul.f32 %v275_v30, %v269_v23 }
  0x71   : > { %v288_v37 = vmul.f32 %v435_v29, %v282_v33 }
  0x72   : > { %v289_v38 = vmul.f32 %v436_v32, %v283_v35 }
  0x73   : > { %v292_v39 = vsub.f32 %v288_v37, %v290_v34 }
  0x74   : > { %v293_v40 = vsub.f32 %v289_v38, %v291_v36 }
  0x76   : > { %v303_v41 = vadd.f32 %v293_v40, %v292_v39 }
  0x78   : > { %304 = vst [vmem:[%s231_s22] sm:$0xff] %v303_v41 }
  0x79   : > { %613 = shalt.err (!%p610_p10)
}
  0x7a   : > { %s614_s14 = scalar_lea.hbm %s317_s7, 128  ;;  %s618_s4 = scalar_lea.hbm %s912_s2, 256 }
  0x7b   : > { %p615_p11 = scmp.ne.s32.totalorder %s317_s7, %s614_s14  ;;  %p619_p7 = scmp.lt.s32.totalorder %s317_s7, %s912_s2 }
  0x7c   : > { %p620_p6 = scmp.lt.s32.totalorder %s618_s4, %s614_s14 }
  0x7d   : > { %p616_p1 = pnand %p615_p11, %p923_p4 }
  0x7e   : > { %p621_p5 = por %p620_p6, %p619_p7 }
  0x7f   : > { %p617_p3 = pneg %p616_p1 }
  0x81   : > { %p622_p2 = pnand %p621_p5, %p617_p3 }
  0x83   : > { %625 = shalt.err (!%p622_p2)
}
  0x84   : > { %447 = dma.vmem_to_hbm [thread:$0]  (%p923_p4), %s320_s27, 128, %s317_s7, %s306_s8  }
  0x85 PF: > { %s331_s17 = sand.u32 1, %s677_s9   ;;  %p924_p12 = scmp.ne.s32.totalorder %s918_s26, 0 }
  0x86   : > { %p925_p13 = scmp.ge.s32.totalorder %s705_s16, 2  ;;  %s332_s22 = scalar_lea.sflag [#allocation5], %s331_s17 }
  0x88   : > { %p457_p0 = pnand %p925_p13, %p924_p12 }
  0x8a   : > { %p458_p8 = pneg %p457_p0 }
  0x8c   : > { %671 = dma.done.wait (%p458_p8), %s332_s22, 128  }
  0x8d   : > { %673 = vsyncadd (%p458_p8), %s332_s22, 4294967168  ;;  %s21_s16 = sadd.s32 1, %s705_s16   ;;  %s926_s9 = smov %s681_s10 }
  0x8e   : > { %p18_p9 = scmp.ge.s32.totalorder %s21_s16, 4   ;;  %s927_s10 = smov %s685_s11 }
  0x8f   : > { %s928_s11 = smov %s785_s24  ;;  %s929_s12 = smov %s693_s13 }
  0x90   : > { %s900_s13 = smov 0   ;;  %s930_s14 = smov %s701_s15 }
  0x91   : > { %s931_s15 = smov %s933_s19  ;;  %20 = sbr.rel (!%p18_p9) target bundleno = 9 (0x9), region = 94 }
  0x96   :  { %337 = vsyncpa [#allocation4], 1 }
  0x97   :  { %339 = vsyncpa [#allocation4 + $0x1], 1 }
  0x98   :  { %340 = vsyncpa [#allocation7], 1 }
  0x99   :  { %342 = vsyncpa [#allocation7 + $0x1], 1 }
  0x9a   :  { %343 = vsyncpa [#allocation5], 1 }
  0x9b   :  { %345 = vsyncpa [#allocation5 + $0x1], 1 }

</bundles_post_ra>
